<compile_context>
chip_gen: v7x
topology: tpu7x:2x2x1
jax: 0.10.0
libtpu: 0.0.40
codegen_flags: <defaults>
</compile_context>

<pallas_src>
import functools

import numpy as np
import jax
import jax.numpy as jnp
from jax.experimental import pallas as pl
from jax.experimental.pallas import tpu as pltpu


def _line_pool_kernel(pts_ref, feat_ref, out_ref, *, b, step, H, W, size, ratio, tn):
    # pts_ref : (4, b)    f32, rows = (x1, y1, x2, y2), raw (un-normalized) endpoints
    # feat_ref: (C, H*W)  feature map, spatial row-major (p = y*W + x), VMEM-resident
    # out_ref : (C, tn)   pooled samples for this tile; global sample s = tile*tn + lane
    base = pl.program_id(0) * tn

    # ---- endpoint normalization to [-1, 1] (mirrors the PyTorch op sequence) ----
    denom = float(size) / float(ratio) - 1.0
    pts = pts_ref[...] / float(size - 1) * denom
    pts = (pts / denom - 0.5) * 2.0                                     # (4, b)

    # ---- per-sample line id / interpolation parameter, samples along lanes ----
    s = (jax.lax.broadcasted_iota(jnp.int32, (1, tn), 1) + base).astype(jnp.float32)
    line = jnp.floor(s / float(step))                                   # (1, tn)
    t = (s - line * float(step)) / float(step - 1)                      # (1, tn) in [0, 1]

    # One-hot endpoint broadcast: ep[:, s] = pts[:, line(s)] via a tiny MXU matmul.
    # The f32 integer compare is exact for total sample counts < 2^24.
    # Padded samples (line >= b) get all-zero columns; sliced off in the wrapper.
    line_ids = jax.lax.broadcasted_iota(jnp.int32, (b, 1), 0).astype(jnp.float32)
    onehot = (line == line_ids).astype(jnp.float32)                     # (b, tn)
    ep = jnp.dot(pts, onehot, preferred_element_type=jnp.float32)       # (4, tn)

    # F.interpolate(mode='linear', align_corners=True) along each line.
    xs = ep[0:1] + (ep[2:3] - ep[0:1]) * t                              # (1, tn)
    ys = ep[1:2] + (ep[3:4] - ep[1:2]) * t                              # (1, tn)

    # grid_sample align_corners=False: pixel = ((coord + 1) * size - 1) / 2
    ix = ((xs + 1.0) * float(W) - 1.0) * 0.5                            # (1, tn)
    iy = ((ys + 1.0) * float(H) - 1.0) * 0.5                            # (1, tn)

    # ---- separable bilinear "hat" weights (review: ~1 VPU mul per element) ----
    yy = jax.lax.broadcasted_iota(jnp.int32, (H, 1), 0).astype(jnp.float32)
    xx = jax.lax.broadcasted_iota(jnp.int32, (W, 1), 0).astype(jnp.float32)
    wy = jnp.maximum(0.0, 1.0 - jnp.abs(iy - yy))                       # (H, tn)
    wx = jnp.maximum(0.0, 1.0 - jnp.abs(ix - xx))                       # (W, tn)
    # Out-of-bounds pixels naturally get weight 0 == padding_mode='zeros'.
    # (H, W, tn) -> (H*W, tn): layout-preserving collapse when W % 8 == 0.
    wmat = (wy[:, None, :] * wx[None, :, :]).reshape(H * W, tn)         # (H*W, tn)

    # One lane-dense MXU matmul: (C, H*W) x (H*W, tn) -> (C, tn).
    out = jnp.dot(feat_ref[...], wmat, preferred_element_type=jnp.float32)
    out_ref[...] = out.astype(out_ref.dtype)


def _choose_tile(m, hw):
    """Lane tile TN: multiple of 256 (lane/MXU dense on all generations), sized so the
    (H*W, TN) f32 hat-weight tile stays <= ~8 MiB (v7x-safe)."""
    tn = 2048
    while tn > 256 and hw * tn * 4 > (8 << 20):
        tn //= 2
    m_ceil = max(256, -(-m // 256) * 256)
    tn = min(tn, m_ceil)
    m_pad = -(-m // tn) * tn
    return tn, m_pad


def line_pooling_layer(feat_map, line_pts, ratio, *, size, step=49, tn=None):
    """feat_map: (1, C, H, W) NCHW; line_pts: (1, b, >=4); ratio: python scalar."""
    f_size = int(np.sqrt(step))
    assert f_size * f_size == step and step > 1, "step must be a perfect square > 1"
    assert float(size) != float(ratio), "size == ratio divides by zero (as in the reference)"
    b = line_pts.shape[1]
    _, C, H, W = feat_map.shape

    m = b * step
    if tn is None:
        tn, m_pad = _choose_tile(m, H * W)
    else:
        m_pad = -(-m // tn) * tn
    grid = (m_pad // tn,)

    pts_t = jnp.transpose(line_pts[0, :, :4], (1, 0)).astype(jnp.float32)  # (4, b)
    feat_flat = feat_map[0].reshape(C, H * W)                              # (C, H*W): free reshape

    kernel = functools.partial(
        _line_pool_kernel, b=b, step=step, H=H, W=W,
        size=float(size), ratio=float(ratio), tn=tn)

    # Scoped-VMEM budget: resident feat (double-buffered) + per-tile hat weights
    # + separable factors + double-buffered output tile, with margin.  Capped at
    # 64 MiB so it is always legal on v7x (smallest physical VMEM).
    est = 4 * (2 * C * H * W + (H * W) * tn + (H + W + b + 16) * tn + 2 * C * tn) + (2 << 20)
    vmem_limit = int(min(max(2 * est, 32 << 20), 64 << 20))

    out = pl.pallas_call(
        kernel,
        out_shape=jax.ShapeDtypeStruct((C, m_pad), feat_map.dtype),
        grid=grid,
        in_specs=[
            pl.BlockSpec((4, b), lambda i: (0, 0)),        # endpoints, VMEM-resident
            pl.BlockSpec((C, H * W), lambda i: (0, 0)),    # feature map, VMEM-resident
        ],
        out_specs=pl.BlockSpec((C, tn), lambda i: (0, i)),
        compiler_params=pltpu.CompilerParams(
            dimension_semantics=("parallel",),             # sample tiles are independent
            vmem_limit_bytes=vmem_limit),
    )(pts_t, feat_flat)

    # (C, m_pad) -> (b, C, f, f), matching F.grid_sample's output ordering.
    out = out[:, :m].reshape(C, b, step)
    out = jnp.transpose(out, (1, 0, 2))
    return out.reshape(b, C, f_size, f_size)


def _reference(feat_map, line_pts, ratio, *, size, step):
    """Independent pure-JAX re-implementation of the PyTorch forward (gather-based)."""
    f_size = int(np.sqrt(step))
    b = line_pts.shape[1]
    _, C, H, W = feat_map.shape
    denom = float(size) / float(ratio) - 1.0
    pts = line_pts[0, :, :4].astype(jnp.float32) / float(size - 1) * denom
    pts = (pts / denom - 0.5) * 2.0                                       # (b, 4)
    t = jnp.arange(step, dtype=jnp.float32) / float(step - 1)             # (step,)
    xs = pts[:, 0:1] + (pts[:, 2:3] - pts[:, 0:1]) * t[None, :]           # (b, step)
    ys = pts[:, 1:2] + (pts[:, 3:4] - pts[:, 1:2]) * t[None, :]
    ix = ((xs + 1.0) * W - 1.0) * 0.5
    iy = ((ys + 1.0) * H - 1.0) * 0.5
    x0 = jnp.floor(ix)
    y0 = jnp.floor(iy)
    feat = feat_map[0].astype(jnp.float32)                                # (C, H, W)
    out = jnp.zeros((C, b, step), jnp.float32)
    for dy in (0, 1):
        for dx in (0, 1):
            xp = x0 + dx
            yp = y0 + dy
            w = (jnp.maximum(0.0, 1.0 - jnp.abs(ix - xp)) *
                 jnp.maximum(0.0, 1.0 - jnp.abs(iy - yp)))
            inb = (xp >= 0) & (xp <= W - 1) & (yp >= 0) & (yp <= H - 1)
            xi = jnp.clip(xp, 0, W - 1).astype(jnp.int32)
            yi = jnp.clip(yp, 0, H - 1).astype(jnp.int32)
            out = out + feat[:, yi, xi] * jnp.where(inb, w, 0.0)[None]
    return jnp.transpose(out, (1, 0, 2)).reshape(b, C, f_size, f_size)


if __name__ == "__main__":
    key = jax.random.PRNGKey(0)
    k_feat, k_pts = jax.random.split(key)

    size = 16          # Line_Pooling_Layer(size=16, step=49)
    ratio = 1.0        # feature map spatial extent = size / ratio = 16
    step = 49
    b_lines = 8
    C, H, W = 4, 16, 16

    feat_map = jax.random.normal(k_feat, (1, C, H, W), dtype=jnp.float32)
    line_pts = jax.random.uniform(k_pts, (1, b_lines, 4),
                                  minval=0.0, maxval=float(size - 1),
                                  dtype=jnp.float32)

    f_lp = line_pooling_layer(feat_map, line_pts, ratio, size=size, step=step)
    f_lp = jax.block_until_ready(f_lp)
    assert f_lp.shape == (b_lines, C, 7, 7), f_lp.shape
    assert bool(jnp.all(jnp.isfinite(f_lp)))

    # Loose tolerance: structural/indexing bugs produce O(1) errors, while any
    # reduced-precision MXU pass for the f32 matmuls stays far below this bound.
    ref = _reference(feat_map, line_pts, ratio, size=size, step=step)
    err = float(jnp.max(jnp.abs(f_lp.astype(jnp.float32) - ref)))
    assert err < 1.5e-1, f"max abs error vs reference: {err}"

    print("KERNEL_OK")
</pallas_src>

<mosaic_0001>
module attributes {stable_mosaic.version = 11 : i64} {
  func.func @_line_pool_kernel(%arg0: i32, %arg1: memref<4x8xf32, #tpu.memory_space<vmem>>, %arg2: memref<4x256xf32, #tpu.memory_space<vmem>>, %arg3: memref<4x512xf32, #tpu.memory_space<vmem>>) attributes {dimension_semantics = [#tpu.dimension_semantics<parallel>], iteration_bounds = array<i64: 1>, scalar_prefetch = 0 : i64, scratch_operands = 0 : i64, tpu.core_type = #tpu.core_type<tc>, window_params = [{pipeline_mode = #tpu.pipeline_mode<synchronous>, transform_indices = @transform_0, window_bounds = array<i64: 4, 8>}, {pipeline_mode = #tpu.pipeline_mode<synchronous>, transform_indices = @transform_1, window_bounds = array<i64: 4, 256>}, {transform_indices = @transform_2, window_bounds = array<i64: 4, 512>}]} {
    %c512_i32 = arith.constant 512 : i32
    %0 = arith.muli %arg0, %c512_i32 : i32
    %c0 = arith.constant 0 : index
    %c0_0 = arith.constant 0 : index
    %1 = vector.load %arg1[%c0, %c0_0] : memref<4x8xf32, #tpu.memory_space<vmem>>, vector<4x8xf32>
    %cst = arith.constant 1.500000e+01 : f32
    %2 = vector.broadcast %cst : f32 to vector<4x8xf32>
    %3 = arith.divf %1, %2 : vector<4x8xf32>
    %cst_1 = arith.constant 1.500000e+01 : f32
    %4 = vector.broadcast %cst_1 : f32 to vector<4x8xf32>
    %5 = arith.mulf %3, %4 : vector<4x8xf32>
    %cst_2 = arith.constant 1.500000e+01 : f32
    %6 = vector.broadcast %cst_2 : f32 to vector<4x8xf32>
    %7 = arith.divf %5, %6 : vector<4x8xf32>
    %cst_3 = arith.constant 5.000000e-01 : f32
    %8 = vector.broadcast %cst_3 : f32 to vector<4x8xf32>
    %9 = arith.subf %7, %8 : vector<4x8xf32>
    %cst_4 = arith.constant 2.000000e+00 : f32
    %10 = vector.broadcast %cst_4 : f32 to vector<4x8xf32>
    %11 = arith.mulf %9, %10 : vector<4x8xf32>
    %12 = tpu.iota {dimensions = array<i32: 1>} : vector<1x512xi32>
    %13 = vector.broadcast %0 : i32 to vector<1x512xi32>
    %14 = arith.addi %12, %13 : vector<1x512xi32>
    %15 = arith.sitofp %14 : vector<1x512xi32> to vector<1x512xf32>
    %cst_5 = arith.constant 4.900000e+01 : f32
    %16 = vector.broadcast %cst_5 : f32 to vector<1x512xf32>
    %17 = arith.divf %15, %16 : vector<1x512xf32>
    %18 = math.floor %17 : vector<1x512xf32>
    %cst_6 = arith.constant 4.900000e+01 : f32
    %19 = vector.broadcast %cst_6 : f32 to vector<1x512xf32>
    %20 = arith.mulf %18, %19 : vector<1x512xf32>
    %21 = arith.subf %15, %20 : vector<1x512xf32>
    %cst_7 = arith.constant 4.800000e+01 : f32
    %22 = vector.broadcast %cst_7 : f32 to vector<1x512xf32>
    %23 = arith.divf %21, %22 : vector<1x512xf32>
    %24 = tpu.iota {dimensions = array<i32: 0>} : vector<8x1xi32>
    %25 = arith.sitofp %24 : vector<8x1xi32> to vector<8x1xf32>
    %26 = vector.broadcast %18 : vector<1x512xf32> to vector<8x512xf32>
    %27 = vector.broadcast %25 : vector<8x1xf32> to vector<8x512xf32>
    %28 = arith.cmpf oeq, %26, %27 : vector<8x512xf32>
    %29 = arith.extui %28 : vector<8x512xi1> to vector<8x512xi32>
    %30 = arith.sitofp %29 : vector<8x512xi32> to vector<8x512xf32>
    %cst_8 = arith.constant dense<0.000000e+00> : vector<4x512xf32>
    %31 = tpu.matmul %11, %30, %cst_8 {dimension_numbers = #tpu.dot_dimension_numbers<[1], [0], [0], [1], [0, 0, 1, 1], [], []>} : vector<4x8xf32>, vector<8x512xf32>, vector<4x512xf32> -> vector<4x512xf32>
    %32 = vector.extract_strided_slice %31 {offsets = [0, 0], sizes = [1, 512], strides = [1, 1]} : vector<4x512xf32> to vector<1x512xf32>
    %33 = vector.extract_strided_slice %31 {offsets = [2, 0], sizes = [1, 512], strides = [1, 1]} : vector<4x512xf32> to vector<1x512xf32>
    %34 = vector.extract_strided_slice %31 {offsets = [0, 0], sizes = [1, 512], strides = [1, 1]} : vector<4x512xf32> to vector<1x512xf32>
    %35 = arith.subf %33, %34 : vector<1x512xf32>
    %36 = arith.mulf %35, %23 : vector<1x512xf32>
    %37 = arith.addf %32, %36 : vector<1x512xf32>
    %38 = vector.extract_strided_slice %31 {offsets = [1, 0], sizes = [1, 512], strides = [1, 1]} : vector<4x512xf32> to vector<1x512xf32>
    %39 = vector.extract_strided_slice %31 {offsets = [3, 0], sizes = [1, 512], strides = [1, 1]} : vector<4x512xf32> to vector<1x512xf32>
    %40 = vector.extract_strided_slice %31 {offsets = [1, 0], sizes = [1, 512], strides = [1, 1]} : vector<4x512xf32> to vector<1x512xf32>
    %41 = arith.subf %39, %40 : vector<1x512xf32>
    %42 = arith.mulf %41, %23 : vector<1x512xf32>
    %43 = arith.addf %38, %42 : vector<1x512xf32>
    %cst_9 = arith.constant 1.000000e+00 : f32
    %44 = vector.broadcast %cst_9 : f32 to vector<1x512xf32>
    %45 = arith.addf %37, %44 : vector<1x512xf32>
    %cst_10 = arith.constant 1.600000e+01 : f32
    %46 = vector.broadcast %cst_10 : f32 to vector<1x512xf32>
    %47 = arith.mulf %45, %46 : vector<1x512xf32>
    %cst_11 = arith.constant 1.000000e+00 : f32
    %48 = vector.broadcast %cst_11 : f32 to vector<1x512xf32>
    %49 = arith.subf %47, %48 : vector<1x512xf32>
    %cst_12 = arith.constant 5.000000e-01 : f32
    %50 = vector.broadcast %cst_12 : f32 to vector<1x512xf32>
    %51 = arith.mulf %49, %50 : vector<1x512xf32>
    %cst_13 = arith.constant 1.000000e+00 : f32
    %52 = vector.broadcast %cst_13 : f32 to vector<1x512xf32>
    %53 = arith.addf %43, %52 : vector<1x512xf32>
    %cst_14 = arith.constant 1.600000e+01 : f32
    %54 = vector.broadcast %cst_14 : f32 to vector<1x512xf32>
    %55 = arith.mulf %53, %54 : vector<1x512xf32>
    %cst_15 = arith.constant 1.000000e+00 : f32
    %56 = vector.broadcast %cst_15 : f32 to vector<1x512xf32>
    %57 = arith.subf %55, %56 : vector<1x512xf32>
    %cst_16 = arith.constant 5.000000e-01 : f32
    %58 = vector.broadcast %cst_16 : f32 to vector<1x512xf32>
    %59 = arith.mulf %57, %58 : vector<1x512xf32>
    %60 = tpu.iota {dimensions = array<i32: 0>} : vector<16x1xi32>
    %61 = arith.sitofp %60 : vector<16x1xi32> to vector<16x1xf32>
    %62 = tpu.iota {dimensions = array<i32: 0>} : vector<16x1xi32>
    %63 = arith.sitofp %62 : vector<16x1xi32> to vector<16x1xf32>
    %64 = vector.broadcast %59 : vector<1x512xf32> to vector<16x512xf32>
    %65 = vector.broadcast %61 : vector<16x1xf32> to vector<16x512xf32>
    %66 = arith.subf %64, %65 : vector<16x512xf32>
    %67 = math.absf %66 : vector<16x512xf32>
    %cst_17 = arith.constant 1.000000e+00 : f32
    %68 = vector.broadcast %cst_17 : f32 to vector<16x512xf32>
    %69 = arith.subf %68, %67 : vector<16x512xf32>
    %cst_18 = arith.constant 0.000000e+00 : f32
    %70 = vector.broadcast %cst_18 : f32 to vector<16x512xf32>
    %71 = arith.maximumf %70, %69 : vector<16x512xf32>
    %72 = vector.broadcast %51 : vector<1x512xf32> to vector<16x512xf32>
    %73 = vector.broadcast %63 : vector<16x1xf32> to vector<16x512xf32>
    %74 = arith.subf %72, %73 : vector<16x512xf32>
    %75 = math.absf %74 : vector<16x512xf32>
    %cst_19 = arith.constant 1.000000e+00 : f32
    %76 = vector.broadcast %cst_19 : f32 to vector<16x512xf32>
    %77 = arith.subf %76, %75 : vector<16x512xf32>
    %cst_20 = arith.constant 0.000000e+00 : f32
    %78 = vector.broadcast %cst_20 : f32 to vector<16x512xf32>
    %79 = arith.maximumf %78, %77 : vector<16x512xf32>
    %80 = vector.shape_cast %71 : vector<16x512xf32> to vector<16x1x512xf32>
    %81 = vector.shape_cast %79 : vector<16x512xf32> to vector<1x16x512xf32>
    %82 = vector.broadcast %80 : vector<16x1x512xf32> to vector<16x16x512xf32>
    %83 = vector.broadcast %81 : vector<1x16x512xf32> to vector<16x16x512xf32>
    %84 = arith.mulf %82, %83 : vector<16x16x512xf32>
    %85 = vector.shape_cast %84 : vector<16x16x512xf32> to vector<256x512xf32>
    %c0_21 = arith.constant 0 : index
    %c0_22 = arith.constant 0 : index
    %86 = vector.load %arg2[%c0_21, %c0_22] : memref<4x256xf32, #tpu.memory_space<vmem>>, vector<4x256xf32>
    %cst_23 = arith.constant dense<0.000000e+00> : vector<4x512xf32>
    %87 = tpu.matmul %86, %85, %cst_23 {dimension_numbers = #tpu.dot_dimension_numbers<[1], [0], [0], [1], [0, 0, 1, 1], [], []>} : vector<4x256xf32>, vector<256x512xf32>, vector<4x512xf32> -> vector<4x512xf32>
    %c0_24 = arith.constant 0 : index
    %c0_25 = arith.constant 0 : index
    %88 = vector.load %arg3[%c0_24, %c0_25] : memref<4x512xf32, #tpu.memory_space<vmem>>, vector<4x512xf32>
    tpu.vector_store %arg3[%c0_24, %c0_25], %87 {strides = array<i32>} : memref<4x512xf32, #tpu.memory_space<vmem>>, vector<4x512xf32>,
    return
  }
  func.func @transform_0(%arg0: i32) -> (i32, i32) {
    %c0_i32 = arith.constant 0 : i32
    %c0_i32_0 = arith.constant 0 : i32
    %c0_i32_1 = arith.constant 0 : i32
    return %c0_i32, %c0_i32_0 : i32, i32
  }
  func.func @transform_1(%arg0: i32) -> (i32, i32) {
    %c0_i32 = arith.constant 0 : i32
    %c0_i32_0 = arith.constant 0 : i32
    %c0_i32_1 = arith.constant 0 : i32
    return %c0_i32, %c0_i32_0 : i32, i32
  }
  func.func @transform_2(%arg0: i32) -> (i32, i32) {
    %c0_i32 = arith.constant 0 : i32
    %c0_i32_0 = arith.constant 0 : i32
    return %c0_i32, %arg0 : i32, i32
  }
}

</mosaic_0001>

<bundles_post_ra>
// kernel: tpu_custom_call.1
= control target key start
LH: loop header
LB: loop body
LE: loop exit
PB: predicated region body
PF: predicated region fallthrough
CT: control target
= control target key end

     0   :  { %7 = vsyncpa [#allocation3], 0  ;;  %s1763_s0 = inlined_call_operand.hbm [shape: f32[4,8], index: 0, kind: input, shape index: {}]   ;;  %s1764_s1 = inlined_call_operand.hbm [shape: f32[4,256], index: 1, kind: input, shape index: {}]   ;;  %s1765_s2 = inlined_call_operand.hbm [shape: f32[4,512], index: 2, kind: output, shape index: {}]  }
   0x1   :  { %8 = vsyncpa [#allocation6], 0 }
   0x2   :  { %9 = vsyncpa [#allocation4], 0  ;;  %s1377_s9 = smov [#allocation2]   ;;  %s1378_s11 = smov [#allocation5]  }
   0x3   :  { %s16_s10 = sshll.u32 %s1377_s9, 4  ;;  %s26_s12 = sshll.u32 %s1378_s11, 4  ;;  %s17_s10 = int_to_ptr.vmem [resolvable:$true] %s16_s10  ;;  %s27_s12 = int_to_ptr.vmem [resolvable:$true] %s26_s12 }
   0x4   :  { %s1305_s15 = scalar_lea.hbm %s1763_s0, 64 }
   0x5   :  { %p1306_p0 = scmp.ne.s32.totalorder %s1763_s0, %s1305_s15  ;;  %p1309_p1 = scmp.lt.u32.totalorder %s1305_s15, %s1763_s0 }
   0x7   :  { %p1311_p2 = pnand %p1309_p1, %p1306_p0 }
   0x9   :  { %1314 = shalt.err (!%p1311_p2)
}
   0xa   :  { %s1315_s20 = scalar_lea.vmem %s17_s10, 64  ;;  %p1320_p4 = scmp.lt.s32.totalorder %s17_s10, %s17_s10 }
   0xb   :  { %p1316_p3 = scmp.ne.s32.totalorder %s17_s10, %s1315_s20  ;;  %p1321_p5 = scmp.lt.s32.totalorder %s1315_s20, %s1315_s20 }
   0xd   :  { %p1322_p6 = por %p1321_p5, %p1320_p4 }
   0xf   :  { %p1323_p7 = pnand %p1322_p6, %p1316_p3 }
  0x11   :  { %1326 = shalt.err (!%p1323_p7)
}
  0x12   :  { %19 = dma.hbm_to_vmem [thread:$0]  %s1763_s0, 64, %s17_s10, [#allocation3]  }
  0x13   :  { %s1327_s25 = scalar_lea.hbm %s1764_s1, 128 }
  0x14   :  { %p1328_p8 = scmp.ne.s32.totalorder %s1764_s1, %s1327_s25  ;;  %p1331_p9 = scmp.lt.u32.totalorder %s1327_s25, %s1764_s1 }
  0x16   :  { %p1333_p10 = pnand %p1331_p9, %p1328_p8 }
  0x18   :  { %1336 = shalt.err (!%p1333_p10)
}
  0x19   :  { %s1337_s30 = scalar_lea.vmem %s27_s12, 128  ;;  %p1342_p12 = scmp.lt.s32.totalorder %s27_s12, %s27_s12 }
  0x1a   :  { %p1338_p11 = scmp.ne.s32.totalorder %s27_s12, %s1337_s30  ;;  %p1343_p13 = scmp.lt.s32.totalorder %s1337_s30, %s1337_s30 }
  0x1c   :  { %p1344_p0 = por %p1343_p13, %p1342_p12 }
  0x1e   :  { %p1345_p1 = pnand %p1344_p0, %p1338_p11 }
  0x20   :  { %1348 = shalt.err (!%p1345_p1)
}
  0x21   :  { %29 = dma.hbm_to_vmem [thread:$0]  %s1764_s1, 128, %s27_s12, [#allocation6]  }
  0x22   :  { %1371 = dma.done.wait [#allocation3], 64  }
  0x23   :  { %1372 = vsyncadd [#allocation3], 4294967232 }
  0x24   :  { %1373 = dma.done.wait [#allocation6], 128  }
  0x25   :  { %1374 = vsyncadd [#allocation6], 4294967168  ;;  %v44_v0 = vlaneseq  ;;  %v1379_v1 = vmov 0.0   ;;  %v37_v11 = vld [vmem:[#allocation2] sm:$0xf]  ;;  %v1380_v24 = vmov 1.0  }
  0x26   :  { %163 = vmatprep.mubr.f32.mxu0 %v1379_v1  ;;  %234 = vmatprep.mubr.f32.mxu1 %v1379_v1  ;;  %v39_v15 = vmul.f32 0.06666667, %v37_v11  ;;  %vm95_vm4 = vcmask 64512   ;;  %v1431_v35 = vld [vmem:[#allocation5] sm:$0xff]  ;;  %s1382_s1 = smov [#allocation7]  }
  0x27   :  { %v45_v2 = vand.u32 127, %v44_v0  ;;  %v1422_v3 = vshrl.u32 %v44_v0, 7  ;;  %v985_v36 = vcombine.high %v1431_v35, %v1431_v35  ;;  %s1145_s4 = sshll.u32 %s1382_s1, 4  ;;  %s1146_s4 = int_to_ptr.vmem [resolvable:$true] %s1145_s4 }
  0x28   :  { %v40_v20 = vmul.f32 15.0, %v39_v15  ;;  %s1349_s5 = scalar_lea.vmem %s1146_s4, 256  ;;  %p1354_p3 = scmp.lt.s32.totalorder %s1146_s4, %s1146_s4 }
  0x29   :  { %v46_v4 = vadd.s32 128, %v45_v2  ;;  %v48_v5 = vadd.s32 384, %v45_v2  ;;  %v54_v7 = vcvt.s32.f32 %v45_v2  ;;  %v47_v8 = vadd.s32 256, %v45_v2  ;;  %p1350_p2 = scmp.ne.s32.totalorder %s1146_s4, %s1349_s5  ;;  %p1355_p4 = scmp.lt.s32.totalorder %s1349_s5, %s1349_s5 }
  0x2a   :  { %v1425_v9 = vcvt.s32.f32 %v1422_v3  ;;  %v41_v27 = vmul.f32 0.06666667, %v40_v20  ;;  %v1440_v15 = vsub.s32 0, %v1422_v3 }
  0x2b   :  { %v55_v6 = vcvt.s32.f32 %v46_v4  ;;  %v57_v10 = vcvt.s32.f32 %v48_v5  ;;  %v59_v13 = vmul.f32 0.020408163, %v54_v7  ;;  %v56_v14 = vcvt.s32.f32 %v47_v8  ;;  %p1356_p5 = por %p1355_p4, %p1354_p3 }
  0x2c   :  { %v1155_v32 = vadd.f32 -0.5, %v41_v27  ;;  %v1381_v4 = vmov 1966171168  }
  0x2d   :  { %v60_v12 = vmul.f32 0.020408163, %v55_v6  ;;  %v62_v16 = vmul.f32 0.020408163, %v57_v10  ;;  %v63_v18 = vfloor.f32 %v59_v13  ;;  %v61_v19 = vmul.f32 0.020408163, %v56_v14  ;;  %p1357_p6 = pnand %p1356_p5, %p1350_p2 }
  0x2e   :  { %v43_v34 = vmul.f32 2.0, %v1155_v32  ;;  %v404_v5 = vunpack.c.l.s4 %v1381_v4 }
  0x2f   :  { %v64_v17 = vfloor.f32 %v60_v12  ;;  %v66_v21 = vfloor.f32 %v62_v16  ;;  %v67_v23 = vmul.f32 49.0, %v63_v18  ;;  %vm83_vm1 = vcmp.eq.f32.partialorder %v63_v18, %v1425_v9 }
  0x30   :  { %v65_v26 = vfloor.f32 %v61_v19  ;;  %v405_v18 = vunpack.c.0.s8 %v404_v5 }
  0x31   :  { %v68_v22 = vmul.f32 49.0, %v64_v17  ;;  %vm84_vm0 = vcmp.eq.f32.partialorder %v64_v17, %v1425_v9  ;;  %v70_v25 = vmul.f32 49.0, %v66_v21  ;;  %vm86_vm2 = vcmp.eq.f32.partialorder %v66_v21, %v1425_v9 }
  0x32   :  { %1160 = vmatprep.subr.msk.mxu0 %vm84_vm0, %v1380_v24  ;;  %1163 = vmatprep.subr.msk.mxu1 %vm86_vm2, %v1380_v24  ;;  %v71_v29 = vsub.f32 %v54_v7, %v67_v23  ;;  %v69_v31 = vmul.f32 49.0, %v65_v26  ;;  %vm85_vm3 = vcmp.eq.f32.partialorder %v65_v26, %v1425_v9 }
  0x33   :  { %v72_v28 = vsub.f32 %v55_v6, %v68_v22  ;;  %1161 = vmatpush1.msk.msra.mxu0 %vm83_vm1, %v1380_v24  ;;  %v74_v30 = vsub.f32 %v57_v10, %v70_v25  ;;  %1164 = vmatpush1.msk.msra.mxu1 %vm85_vm3, %v1380_v24  ;;  %v293_v10 = vadd.s32 8, %v1422_v3 }
  0x34   :  { %v73_v33 = vsub.f32 %v56_v14, %v69_v31  ;;  %1162 = vmatmul.mubr.msk.f32.vlgmr.msra.gmra.mrb[0].mxu0 %vm95_vm4, %v43_v34  ;;  %1165 = vmatmul.mubr.msk.f32.vlgmr.msra.gmra.mrb[0].mxu1 %vm95_vm4, %v43_v34  ;;  %v76_v37 = vmul.f32 0.020833334, %v71_v29  ;;  %v1437_v14 = vsub.s32 1, %v1422_v3  ;;  %v1449_v29 = vsub.s32 %v405_v18, %v1422_v3 }
  0x35   :  { %1051 = vmatprep.mubr.f32.mxu0 %v985_v36  ;;  %1122 = vmatprep.mubr.f32.mxu1 %v985_v36  ;;  %v77_v45 = vmul.f32 0.020833334, %v72_v28  ;;  %v79_v46 = vmul.f32 0.020833334, %v74_v30  ;;  %v1442_v22 = vcvt.s32.f32 %v293_v10 }
  0x36   :  { %v78_v41 = vmul.f32 0.020833334, %v73_v33 }
 0x107   :  { %v165_v38 = vpop.f32.mrb[0].mxu0  ;;  %v236_v39 = vpop.f32.mrb[0].mxu1 }
 0x108   :  { %v245_v40 = vrot.slane %v165_v38, 6  ;;  %v247_v42 = vrot.slane %v236_v39, 6  ;;  %v167_v43 = vpop.f32.mrb[1].mxu0  ;;  %v238_v44 = vpop.f32.mrb[1].mxu1 }
 0x109   :  { %v246_v47 = vrot.slane %v167_v43, 6  ;;  %v248_v48 = vrot.slane %v238_v44, 6 }
 0x10a   :  { %v253_v49 = vsub.f32 %v165_v38, %v245_v40  ;;  %v255_v50 = vsub.f32 %v236_v39, %v247_v42 }
 0x10b   :  { %v254_v51 = vsub.f32 %v167_v43, %v246_v47  ;;  %v256_v52 = vsub.f32 %v238_v44, %v248_v48 }
 0x10c   :  { %v257_v53 = vmul.f32 %v253_v49, %v76_v37  ;;  %v259_v54 = vmul.f32 %v255_v50, %v78_v41 }
 0x10d   :  { %v258_v55 = vmul.f32 %v254_v51, %v77_v45  ;;  %v260_v56 = vmul.f32 %v256_v52, %v79_v46 }
 0x10e   :  { %v265_v57 = vrot.slane %v257_v53, 2  ;;  %v267_v58 = vrot.slane %v259_v54, 2  ;;  %v1464_v54 = vsub.s32 2, %v1422_v3 }
 0x10f   :  { %v266_v59 = vrot.slane %v258_v55, 2  ;;  %v268_v60 = vrot.slane %v260_v56, 2 }
 0x110   :  { %v273_v61 = vadd.f32 %v265_v57, %v165_v38  ;;  %v275_v62 = vadd.f32 %v267_v58, %v236_v39  ;;  %v1468_v58 = vsub.s32 3, %v1422_v3 }
 0x111   :  { %v274_v63 = vadd.f32 %v266_v59, %v167_v43  ;;  %v276_v0 = vadd.f32 %v268_v60, %v238_v44 }
 0x112   :  { %v277_v1 = vadd.f32 1.0, %v273_v61  ;;  %v279_v2 = vadd.f32 1.0, %v275_v62 }
 0x113   :  { %v278_v6 = vadd.f32 1.0, %v274_v63  ;;  %v280_v7 = vadd.f32 1.0, %v276_v0 }
 0x114   :  { %v281_v8 = vmul.f32 16.0, %v277_v1  ;;  %v283_v11 = vmul.f32 16.0, %v279_v2 }
 0x115   :  { %v282_v12 = vmul.f32 16.0, %v278_v6  ;;  %v284_v13 = vmul.f32 16.0, %v280_v7 }
 0x116   :  { %v1166_v16 = vadd.f32 -1.0, %v281_v8  ;;  %v1168_v17 = vadd.f32 -1.0, %v283_v11 }
 0x117   :  { %v1167_v19 = vadd.f32 -1.0, %v282_v12  ;;  %v1169_v20 = vadd.f32 -1.0, %v284_v13 }
 0x118   :  { %v289_v21 = vmul.f32 0.5, %v1166_v16  ;;  %v291_v23 = vmul.f32 0.5, %v1168_v17 }
 0x119   :  { %v290_v24 = vmul.f32 0.5, %v1167_v19  ;;  %v292_v32 = vmul.f32 0.5, %v1169_v20 }
 0x11a   :  { %v298_v25 = vrot.slane %v289_v21, %v1437_v14  ;;  %v346_v26 = vrot.slane %v289_v21, %v1440_v15  ;;  %v306_v27 = vrot.slane %v291_v23, %v1437_v14  ;;  %v354_v28 = vrot.slane %v291_v23, %v1440_v15 }
 0x11b   :  { %v302_v30 = vrot.slane %v290_v24, %v1437_v14  ;;  %v350_v31 = vrot.slane %v290_v24, %v1440_v15  ;;  %v310_v57 = vrot.slane %v292_v32, %v1437_v14  ;;  %v358_v61 = vrot.slane %v292_v32, %v1440_v15 }
 0x11c   :  { %v311_v33 = vsub.f32 %v298_v25, %v1425_v9  ;;  %v315_v34 = vsub.f32 %v298_v25, %v1442_v22  ;;  %v359_v36 = vsub.f32 %v346_v26, %v1425_v9  ;;  %v363_v37 = vsub.f32 %v346_v26, %v1442_v22 }
 0x11d   :  { %v313_v38 = vsub.f32 %v306_v27, %v1425_v9  ;;  %v317_v39 = vsub.f32 %v306_v27, %v1442_v22  ;;  %v361_v40 = vsub.f32 %v354_v28, %v1425_v9  ;;  %v365_v41 = vsub.f32 %v354_v28, %v1442_v22 }
 0x11e   :  { %v319_v42 = vand.u32 2147483647, %v311_v33  ;;  %v323_v43 = vand.u32 2147483647, %v315_v34  ;;  %v367_v44 = vand.u32 2147483647, %v359_v36  ;;  %v312_v45 = vsub.f32 %v302_v30, %v1425_v9 }
 0x11f   :  { %v371_v46 = vand.u32 2147483647, %v363_v37  ;;  %v321_v47 = vand.u32 2147483647, %v313_v38  ;;  %v325_v48 = vand.u32 2147483647, %v317_v39  ;;  %v316_v49 = vsub.f32 %v302_v30, %v1442_v22 }
 0x120   :  { %v327_v50 = vsub.f32 1.0, %v319_v42  ;;  %v331_v51 = vsub.f32 1.0, %v323_v43  ;;  %v375_v52 = vsub.f32 1.0, %v367_v44  ;;  %v369_v53 = vand.u32 2147483647, %v361_v40 }
 0x121   :  { %v379_v55 = vsub.f32 1.0, %v371_v46  ;;  %v329_v56 = vsub.f32 1.0, %v321_v47  ;;  %v333_v59 = vsub.f32 1.0, %v325_v48  ;;  %v373_v60 = vand.u32 2147483647, %v365_v41 }
 0x122   :  { %v335_v62 = vmax.f32 %v327_v50, 0.0  ;;  %v339_v63 = vmax.f32 %v331_v51, 0.0  ;;  %v1471_v0 = vmax.f32 %v375_v52, 0.0  ;;  %v377_v1 = vsub.f32 1.0, %v369_v53 }
 0x123   :  { %v1473_v2 = vmax.f32 %v379_v55, 0.0  ;;  %v320_v4 = vand.u32 2147483647, %v312_v45  ;;  %v324_v5 = vand.u32 2147483647, %v316_v49  ;;  %v360_v6 = vsub.f32 %v350_v31, %v1425_v9 }
 0x124   :  { %v337_v7 = vmax.f32 %v329_v56, 0.0  ;;  %v364_v8 = vsub.f32 %v350_v31, %v1442_v22  ;;  %v314_v3 = vsub.f32 %v310_v57, %v1425_v9  ;;  %v318_v10 = vsub.f32 %v310_v57, %v1442_v22 }
 0x125   :  { %v328_v11 = vsub.f32 1.0, %v320_v4  ;;  %v332_v12 = vsub.f32 1.0, %v324_v5  ;;  %v368_v13 = vand.u32 2147483647, %v360_v6  ;;  %v362_v16 = vsub.f32 %v358_v61, %v1425_v9 }
 0x126   :  { %v372_v17 = vand.u32 2147483647, %v364_v8  ;;  %v322_v18 = vand.u32 2147483647, %v314_v3  ;;  %v326_v19 = vand.u32 2147483647, %v318_v10  ;;  %v366_v20 = vsub.f32 %v358_v61, %v1442_v22 }
 0x127   :  { %v381_v21 = vsub.f32 1.0, %v373_v60  ;;  %v336_v23 = vmax.f32 %v328_v11, 0.0  ;;  %v340_v24 = vmax.f32 %v332_v12, 0.0  ;;  %v370_v25 = vand.u32 2147483647, %v362_v16 }
 0x128   :  { %v341_v26 = vmax.f32 %v333_v59, 0.0  ;;  %v330_v27 = vsub.f32 1.0, %v322_v18  ;;  %v334_v28 = vsub.f32 1.0, %v326_v19  ;;  %v374_v30 = vand.u32 2147483647, %v366_v20 }
 0x129   :  { %v376_v31 = vsub.f32 1.0, %v368_v13  ;;  %v399_v32 = vcombine.low %v335_v62, %v336_v23  ;;  %v400_v33 = vcombine.high %v335_v62, %v336_v23  ;;  %v467_v34 = vcombine.low %v339_v63, %v340_v24 }
 0x12a   :  { %v380_v36 = vsub.f32 1.0, %v372_v17  ;;  %v468_v37 = vcombine.high %v339_v63, %v340_v24  ;;  %v338_v9 = vmax.f32 %v330_v27, 0.0  ;;  %v342_v38 = vmax.f32 %v334_v28, 0.0 }
 0x12b   :  { %v1481_v39 = vmax.f32 %v377_v1, 0.0  ;;  %v1483_v40 = vmax.f32 %v381_v21, 0.0  ;;  %v409_v22 = vrot.slane %v399_v32, %v1449_v29  ;;  %v378_v41 = vsub.f32 1.0, %v370_v25 }
 0x12c   :  { %v416_v42 = vrot.slane %v400_v33, %v1449_v29  ;;  %v382_v43 = vsub.f32 1.0, %v374_v30  ;;  %v401_v44 = vcombine.low %v337_v7, %v338_v9  ;;  %v402_v45 = vcombine.high %v337_v7, %v338_v9 }
 0x12d   :  { %v477_v46 = vrot.slane %v467_v34, %v1449_v29  ;;  %v484_v47 = vrot.slane %v468_v37, %v1449_v29  ;;  %v469_v48 = vcombine.low %v341_v26, %v342_v38  ;;  %v470_v49 = vcombine.high %v341_v26, %v342_v38 }
 0x12e   :  { %v1489_v50 = vmax.f32 %v376_v31, 0.0  ;;  %v1491_v51 = vmax.f32 %v380_v36, 0.0  ;;  %v423_v52 = vrot.slane %v401_v44, %v1449_v29  ;;  %v430_v53 = vrot.slane %v402_v45, %v1449_v29 }
 0x12f   :  { %v1495_v55 = vmax.f32 %v378_v41, 0.0  ;;  %v1497_v56 = vmax.f32 %v382_v43, 0.0  ;;  %v491_v57 = vrot.slane %v469_v48, %v1449_v29  ;;  %v498_v59 = vrot.slane %v470_v49, %v1449_v29 }
 0x130   :  { %v431_v60 = vcombine.low %v409_v22, %v423_v52  ;;  %v432_v61 = vcombine.high %v409_v22, %v423_v52  ;;  %v433_v62 = vcombine.low %v416_v42, %v430_v53  ;;  %v434_v63 = vcombine.high %v416_v42, %v430_v53 }
 0x131   :  { %v499_v1 = vcombine.low %v477_v46, %v491_v57  ;;  %v500_v4 = vcombine.high %v477_v46, %v491_v57  ;;  %v501_v5 = vcombine.low %v484_v47, %v498_v59  ;;  %v502_v6 = vcombine.high %v484_v47, %v498_v59 }
 0x132   :  { %v441_v7 = vrot.slane %v431_v60, %v1449_v29  ;;  %v1503_v8 = vrot.slane %v433_v62, %v1449_v29  ;;  %v455_v3 = vrot.slane %v432_v61, %v1449_v29  ;;  %v1507_v10 = vrot.slane %v434_v63, %v1449_v29 }
 0x133   :  { %v1510_v11 = vrot.slane %v499_v1, %v1449_v29  ;;  %v1513_v12 = vrot.slane %v501_v5, %v1449_v29  ;;  %v1516_v13 = vrot.slane %v500_v4, %v1449_v29  ;;  %v1519_v16 = vrot.slane %v502_v6, %v1449_v29 }
 0x134   :  { %v542_v17 = vrot.slane %v441_v7, %v1437_v14  ;;  %v550_v18 = vrot.slane %v441_v7, %v1468_v58  ;;  %v538_v19 = vrot.slane %v441_v7, %v1440_v15  ;;  %v546_v20 = vrot.slane %v441_v7, %v1464_v54 }
 0x135   :  { %v558_v21 = vrot.slane %v455_v3, %v1437_v14  ;;  %v566_v23 = vrot.slane %v455_v3, %v1468_v58  ;;  %v554_v24 = vrot.slane %v455_v3, %v1440_v15  ;;  %v562_v25 = vrot.slane %v455_v3, %v1464_v54 }
 0x136   :  { %v856_v26 = vmul.f32 %v542_v17, %v1489_v50  ;;  %v860_v29 = vmul.f32 %v542_v17, %v1491_v51  ;;  %v858_v27 = vmul.f32 %v550_v18, %v1495_v55  ;;  %v862_v28 = vmul.f32 %v550_v18, %v1497_v56 }
 0x137   :  { %v855_v30 = vmul.f32 %v538_v19, %v1471_v0  ;;  %v859_v31 = vmul.f32 %v538_v19, %v1473_v2  ;;  %v857_v32 = vmul.f32 %v546_v20, %v1481_v39  ;;  %v861_v33 = vmul.f32 %v546_v20, %v1483_v40 }
 0x138   :  { %v1170_v34 = vpack.c.bf16 %v860_v29, %v856_v26  ;;  %v1234_v36 = vpack.c.bf16 %v862_v28, %v858_v27  ;;  %v864_v37 = vmul.f32 %v558_v21, %v1489_v50  ;;  %v868_v9 = vmul.f32 %v558_v21, %v1491_v51 }
 0x139   :  { %v1172_v38 = vpack.c.bf16 %v859_v31, %v855_v30  ;;  %v1236_v22 = vpack.c.bf16 %v861_v33, %v857_v32  ;;  %v866_v41 = vmul.f32 %v566_v23, %v1495_v55  ;;  %v870_v42 = vmul.f32 %v566_v23, %v1497_v56 }
 0x13a   :  { %1171 = vmatprep.subr.bf16.mxu0 %v1170_v34  ;;  %1235 = vmatprep.subr.bf16.mxu1 %v1234_v36  ;;  %v1174_v43 = vpack.c.bf16 %v868_v9, %v864_v37  ;;  %v863_v44 = vmul.f32 %v554_v24, %v1471_v0  ;;  %v867_v45 = vmul.f32 %v554_v24, %v1473_v2 }
 0x13b   :  { %1173 = vmatpush1.bf16.msra.mxu0 %v1172_v38  ;;  %1237 = vmatpush1.bf16.msra.mxu1 %v1236_v22  ;;  %v1238_v46 = vpack.c.bf16 %v870_v42, %v866_v41  ;;  %v865_v47 = vmul.f32 %v562_v25, %v1481_v39  ;;  %v869_v48 = vmul.f32 %v562_v25, %v1483_v40 }
 0x13c   :  { %1175 = vmatprep.subr.bf16.mxu0 %v1174_v43  ;;  %v1176_v49 = vpack.c.bf16 %v867_v45, %v863_v44  ;;  %v463_v52 = vcombine.high %v441_v7, %v441_v7  ;;  %v465_v53 = vcombine.high %v455_v3, %v455_v3  ;;  %v606_v57 = vrot.slane %v1503_v8, %v1437_v14 }
 0x13d   :  { %1239 = vmatprep.subr.bf16.mxu1 %v1238_v46  ;;  %v1240_v59 = vpack.c.bf16 %v869_v48, %v865_v47  ;;  %v614_v60 = vrot.slane %v1503_v8, %v1468_v58  ;;  %v602_v61 = vrot.slane %v1503_v8, %v1440_v15  ;;  %v610_v62 = vrot.slane %v1503_v8, %v1464_v54 }
 0x13e   :  { %v574_v63 = vrot.slane %v463_v52, %v1437_v14  ;;  %v582_v1 = vrot.slane %v463_v52, %v1468_v58  ;;  %v570_v4 = vrot.slane %v463_v52, %v1440_v15  ;;  %v578_v5 = vrot.slane %v463_v52, %v1464_v54 }
 0x13f   :  { %1177 = vmatpush1.bf16.msra.mxu0 %v1176_v49  ;;  %1241 = vmatpush1.bf16.msra.mxu1 %v1240_v59  ;;  %v590_v6 = vrot.slane %v465_v53, %v1437_v14  ;;  %v598_v7 = vrot.slane %v465_v53, %v1468_v58  ;;  %v586_v3 = vrot.slane %v465_v53, %v1440_v15 }
 0x140   :  { %v872_v17 = vmul.f32 %v574_v63, %v1489_v50  ;;  %v876_v18 = vmul.f32 %v574_v63, %v1491_v51  ;;  %v874_v19 = vmul.f32 %v582_v1, %v1495_v55  ;;  %v878_v20 = vmul.f32 %v582_v1, %v1497_v56 }
 0x141   :  { %v871_v21 = vmul.f32 %v570_v4, %v1471_v0  ;;  %v875_v23 = vmul.f32 %v570_v4, %v1473_v2  ;;  %v873_v24 = vmul.f32 %v578_v5, %v1481_v39  ;;  %v877_v25 = vmul.f32 %v578_v5, %v1483_v40 }
 0x142   :  { %v1178_v26 = vpack.c.bf16 %v876_v18, %v872_v17  ;;  %v1242_v29 = vpack.c.bf16 %v878_v20, %v874_v19  ;;  %v880_v27 = vmul.f32 %v590_v6, %v1489_v50  ;;  %v884_v28 = vmul.f32 %v590_v6, %v1491_v51 }
 0x143   :  { %v1180_v30 = vpack.c.bf16 %v875_v23, %v871_v21  ;;  %v1244_v31 = vpack.c.bf16 %v877_v25, %v873_v24  ;;  %v882_v32 = vmul.f32 %v598_v7, %v1495_v55  ;;  %v886_v33 = vmul.f32 %v598_v7, %v1497_v56 }
 0x144   :  { %1179 = vmatprep.subr.bf16.mxu0 %v1178_v26  ;;  %1243 = vmatprep.subr.bf16.mxu1 %v1242_v29  ;;  %v1182_v34 = vpack.c.bf16 %v884_v28, %v880_v27  ;;  %v879_v36 = vmul.f32 %v586_v3, %v1471_v0  ;;  %v883_v37 = vmul.f32 %v586_v3, %v1473_v2 }
 0x145   :  { %1181 = vmatpush1.bf16.msra.mxu0 %v1180_v30  ;;  %1245 = vmatpush1.bf16.msra.mxu1 %v1244_v31  ;;  %v1246_v9 = vpack.c.bf16 %v886_v33, %v882_v32  ;;  %v594_v38 = vrot.slane %v465_v53, %v1464_v54  ;;  %v888_v22 = vmul.f32 %v606_v57, %v1489_v50 }
 0x146   :  { %1183 = vmatprep.subr.bf16.mxu0 %v1182_v34  ;;  %v1184_v41 = vpack.c.bf16 %v883_v37, %v879_v36  ;;  %v892_v42 = vmul.f32 %v606_v57, %v1491_v51  ;;  %v890_v43 = vmul.f32 %v614_v60, %v1495_v55  ;;  %v894_v44 = vmul.f32 %v614_v60, %v1497_v56 }
 0x147   :  { %1247 = vmatprep.subr.bf16.mxu1 %v1246_v9  ;;  %v881_v45 = vmul.f32 %v594_v38, %v1481_v39  ;;  %v885_v46 = vmul.f32 %v594_v38, %v1483_v40  ;;  %v887_v47 = vmul.f32 %v602_v61, %v1471_v0  ;;  %v891_v48 = vmul.f32 %v602_v61, %v1473_v2 }
 0x148   :  { %v1186_v49 = vpack.c.bf16 %v892_v42, %v888_v22  ;;  %v1250_v52 = vpack.c.bf16 %v894_v44, %v890_v43  ;;  %v889_v53 = vmul.f32 %v610_v62, %v1481_v39  ;;  %v893_v59 = vmul.f32 %v610_v62, %v1483_v40 }
 0x149   :  { %1185 = vmatpush1.bf16.msra.mxu0 %v1184_v41  ;;  %v1248_v57 = vpack.c.bf16 %v885_v46, %v881_v45  ;;  %v1188_v63 = vpack.c.bf16 %v891_v48, %v887_v47  ;;  %v622_v60 = vrot.slane %v1507_v10, %v1437_v14  ;;  %v630_v1 = vrot.slane %v1507_v10, %v1468_v58 }
 0x14a   :  { %1187 = vmatprep.subr.bf16.mxu0 %v1186_v49  ;;  %v1252_v4 = vpack.c.bf16 %v893_v59, %v889_v53  ;;  %v618_v61 = vrot.slane %v1507_v10, %v1440_v15  ;;  %v626_v5 = vrot.slane %v1507_v10, %v1464_v54  ;;  %v464_v62 = vcombine.high %v1503_v8, %v1503_v8 }
 0x14b   :  { %1249 = vmatpush1.bf16.msra.mxu1 %v1248_v57  ;;  %v896_v6 = vmul.f32 %v622_v60, %v1489_v50  ;;  %v900_v7 = vmul.f32 %v622_v60, %v1491_v51  ;;  %v898_v3 = vmul.f32 %v630_v1, %v1495_v55  ;;  %v902_v17 = vmul.f32 %v630_v1, %v1497_v56 }
 0x14c   :  { %1251 = vmatprep.subr.bf16.mxu1 %v1250_v52  ;;  %v895_v18 = vmul.f32 %v618_v61, %v1471_v0  ;;  %v899_v19 = vmul.f32 %v618_v61, %v1473_v2  ;;  %v897_v20 = vmul.f32 %v626_v5, %v1481_v39  ;;  %v901_v21 = vmul.f32 %v626_v5, %v1483_v40 }
 0x14d   :  { %1189 = vmatpush1.bf16.msra.mxu0 %v1188_v63  ;;  %v1190_v8 = vpack.c.bf16 %v900_v7, %v896_v6  ;;  %v1254_v23 = vpack.c.bf16 %v902_v17, %v898_v3  ;;  %v638_v24 = vrot.slane %v464_v62, %v1437_v14  ;;  %v646_v25 = vrot.slane %v464_v62, %v1468_v58 }
 0x14e   :  { %v1192_v26 = vpack.c.bf16 %v899_v19, %v895_v18  ;;  %v1256_v29 = vpack.c.bf16 %v901_v21, %v897_v20  ;;  %v634_v27 = vrot.slane %v464_v62, %v1440_v15  ;;  %v642_v28 = vrot.slane %v464_v62, %v1464_v54 }
 0x14f   :  { %1253 = vmatpush1.bf16.msra.mxu1 %v1252_v4  ;;  %1191 = vmatprep.subr.bf16.mxu0 %v1190_v8  ;;  %v904_v30 = vmul.f32 %v638_v24, %v1489_v50  ;;  %v908_v31 = vmul.f32 %v638_v24, %v1491_v51  ;;  %v906_v32 = vmul.f32 %v646_v25, %v1495_v55 }
 0x150   :  { %1255 = vmatprep.subr.bf16.mxu1 %v1254_v23  ;;  %v910_v33 = vmul.f32 %v646_v25, %v1497_v56  ;;  %v903_v34 = vmul.f32 %v634_v27, %v1471_v0  ;;  %v907_v36 = vmul.f32 %v634_v27, %v1473_v2  ;;  %v905_v37 = vmul.f32 %v642_v28, %v1481_v39 }
 0x151   :  { %1193 = vmatpush1.bf16.msra.mxu0 %v1192_v26  ;;  %v1194_v9 = vpack.c.bf16 %v908_v31, %v904_v30  ;;  %v909_v38 = vmul.f32 %v642_v28, %v1483_v40  ;;  %v466_v22 = vcombine.high %v1507_v10, %v1507_v10  ;;  %v670_v41 = vrot.slane %v1510_v11, %v1437_v14 }
 0x152   :  { %v1258_v42 = vpack.c.bf16 %v910_v33, %v906_v32  ;;  %v1196_v43 = vpack.c.bf16 %v907_v36, %v903_v34  ;;  %v678_v44 = vrot.slane %v1510_v11, %v1468_v58  ;;  %v666_v45 = vrot.slane %v1510_v11, %v1440_v15 }
 0x153   :  { %1257 = vmatpush1.bf16.msra.mxu1 %v1256_v29  ;;  %1195 = vmatprep.subr.bf16.mxu0 %v1194_v9  ;;  %v1260_v46 = vpack.c.bf16 %v909_v38, %v905_v37  ;;  %v654_v47 = vrot.slane %v466_v22, %v1437_v14  ;;  %v662_v48 = vrot.slane %v466_v22, %v1468_v58 }
 0x154   :  { %1259 = vmatprep.subr.bf16.mxu1 %v1258_v42  ;;  %v650_v10 = vrot.slane %v466_v22, %v1440_v15  ;;  %v658_v49 = vrot.slane %v466_v22, %v1464_v54  ;;  %v920_v52 = vmul.f32 %v670_v41, %v1489_v50  ;;  %v924_v53 = vmul.f32 %v670_v41, %v1491_v51 }
 0x155   :  { %1197 = vmatpush1.bf16.msra.mxu0 %v1196_v43  ;;  %v912_v59 = vmul.f32 %v654_v47, %v1489_v50  ;;  %v916_v57 = vmul.f32 %v654_v47, %v1491_v51  ;;  %v914_v63 = vmul.f32 %v662_v48, %v1495_v55  ;;  %v918_v60 = vmul.f32 %v662_v48, %v1497_v56 }
 0x156   :  { %v911_v1 = vmul.f32 %v650_v10, %v1471_v0  ;;  %v915_v4 = vmul.f32 %v650_v10, %v1473_v2  ;;  %v913_v61 = vmul.f32 %v658_v49, %v1481_v39  ;;  %v917_v5 = vmul.f32 %v658_v49, %v1483_v40 }
 0x157   :  { %1261 = vmatpush1.bf16.msra.mxu1 %v1260_v46  ;;  %v1198_v62 = vpack.c.bf16 %v916_v57, %v912_v59  ;;  %v1262_v6 = vpack.c.bf16 %v918_v60, %v914_v63  ;;  %v1202_v7 = vpack.c.bf16 %v924_v53, %v920_v52  ;;  %v922_v3 = vmul.f32 %v678_v44, %v1495_v55 }
 0x158   :  { %v1200_v17 = vpack.c.bf16 %v915_v4, %v911_v1  ;;  %v1264_v18 = vpack.c.bf16 %v917_v5, %v913_v61  ;;  %v926_v19 = vmul.f32 %v678_v44, %v1497_v56  ;;  %v919_v20 = vmul.f32 %v666_v45, %v1471_v0 }
 0x159   :  { %1199 = vmatprep.subr.bf16.mxu0 %v1198_v62  ;;  %1263 = vmatprep.subr.bf16.mxu1 %v1262_v6  ;;  %v923_v21 = vmul.f32 %v666_v45, %v1473_v2  ;;  %v674_v8 = vrot.slane %v1510_v11, %v1464_v54  ;;  %v686_v23 = vrot.slane %v1516_v13, %v1437_v14 }
 0x15a   :  { %1201 = vmatpush1.bf16.msra.mxu0 %v1200_v17  ;;  %v1266_v24 = vpack.c.bf16 %v926_v19, %v922_v3  ;;  %v694_v25 = vrot.slane %v1516_v13, %v1468_v58  ;;  %v682_v26 = vrot.slane %v1516_v13, %v1440_v15  ;;  %v690_v29 = vrot.slane %v1516_v13, %v1464_v54 }
 0x15b   :  { %1265 = vmatpush1.bf16.msra.mxu1 %v1264_v18  ;;  %1203 = vmatprep.subr.bf16.mxu0 %v1202_v7  ;;  %v1204_v27 = vpack.c.bf16 %v923_v21, %v919_v20  ;;  %v921_v28 = vmul.f32 %v674_v8, %v1481_v39  ;;  %v925_v30 = vmul.f32 %v674_v8, %v1483_v40 }
 0x15c   :  { %1267 = vmatprep.subr.bf16.mxu1 %v1266_v24  ;;  %v928_v31 = vmul.f32 %v686_v23, %v1489_v50  ;;  %v932_v32 = vmul.f32 %v686_v23, %v1491_v51  ;;  %v930_v33 = vmul.f32 %v694_v25, %v1495_v55  ;;  %v934_v34 = vmul.f32 %v694_v25, %v1497_v56 }
 0x15d   :  { %v1268_v36 = vpack.c.bf16 %v925_v30, %v921_v28  ;;  %v927_v37 = vmul.f32 %v682_v26, %v1471_v0  ;;  %v931_v9 = vmul.f32 %v682_v26, %v1473_v2  ;;  %v929_v38 = vmul.f32 %v690_v29, %v1481_v39 }
 0x15e   :  { %1205 = vmatpush1.bf16.msra.mxu0 %v1204_v27  ;;  %v1206_v22 = vpack.c.bf16 %v932_v32, %v928_v31  ;;  %v1270_v41 = vpack.c.bf16 %v934_v34, %v930_v33  ;;  %v933_v42 = vmul.f32 %v690_v29, %v1483_v40  ;;  %v531_v43 = vcombine.high %v1510_v11, %v1510_v11 }
 0x15f   :  { %1269 = vmatpush1.bf16.msra.mxu1 %v1268_v36  ;;  %v1208_v44 = vpack.c.bf16 %v931_v9, %v927_v37  ;;  %v533_v45 = vcombine.high %v1516_v13, %v1516_v13  ;;  %v734_v46 = vrot.slane %v1513_v12, %v1437_v14  ;;  %v742_v47 = vrot.slane %v1513_v12, %v1468_v58 }
 0x160   :  { %1207 = vmatprep.subr.bf16.mxu0 %v1206_v22  ;;  %1271 = vmatprep.subr.bf16.mxu1 %v1270_v41  ;;  %v1272_v48 = vpack.c.bf16 %v933_v42, %v929_v38  ;;  %v702_v10 = vrot.slane %v531_v43, %v1437_v14  ;;  %v710_v49 = vrot.slane %v531_v43, %v1468_v58 }
 0x161   :  { %v698_v11 = vrot.slane %v531_v43, %v1440_v15  ;;  %v706_v52 = vrot.slane %v531_v43, %v1464_v54  ;;  %v718_v53 = vrot.slane %v533_v45, %v1437_v14  ;;  %v726_v13 = vrot.slane %v533_v45, %v1468_v58 }
 0x162   :  { %1209 = vmatpush1.bf16.msra.mxu0 %v1208_v44  ;;  %v936_v59 = vmul.f32 %v702_v10, %v1489_v50  ;;  %v940_v57 = vmul.f32 %v702_v10, %v1491_v51  ;;  %v938_v63 = vmul.f32 %v710_v49, %v1495_v55  ;;  %v942_v60 = vmul.f32 %v710_v49, %v1497_v56 }
 0x163   :  { %1273 = vmatpush1.bf16.msra.mxu1 %v1272_v48  ;;  %v935_v1 = vmul.f32 %v698_v11, %v1471_v0  ;;  %v939_v4 = vmul.f32 %v698_v11, %v1473_v2  ;;  %v937_v61 = vmul.f32 %v706_v52, %v1481_v39  ;;  %v941_v5 = vmul.f32 %v706_v52, %v1483_v40 }
 0x164   :  { %v1210_v62 = vpack.c.bf16 %v940_v57, %v936_v59  ;;  %v1274_v6 = vpack.c.bf16 %v942_v60, %v938_v63  ;;  %v944_v7 = vmul.f32 %v718_v53, %v1489_v50  ;;  %v948_v3 = vmul.f32 %v718_v53, %v1491_v51 }
 0x165   :  { %v1212_v17 = vpack.c.bf16 %v939_v4, %v935_v1  ;;  %v1276_v18 = vpack.c.bf16 %v941_v5, %v937_v61  ;;  %v946_v19 = vmul.f32 %v726_v13, %v1495_v55  ;;  %v950_v20 = vmul.f32 %v726_v13, %v1497_v56 }
 0x166   :  { %1211 = vmatprep.subr.bf16.mxu0 %v1210_v62  ;;  %1275 = vmatprep.subr.bf16.mxu1 %v1274_v6  ;;  %v1214_v21 = vpack.c.bf16 %v948_v3, %v944_v7  ;;  %v714_v8 = vrot.slane %v533_v45, %v1440_v15  ;;  %v722_v23 = vrot.slane %v533_v45, %v1464_v54 }
 0x167   :  { %1213 = vmatpush1.bf16.msra.mxu0 %v1212_v17  ;;  %1277 = vmatpush1.bf16.msra.mxu1 %v1276_v18  ;;  %v1278_v24 = vpack.c.bf16 %v950_v20, %v946_v19  ;;  %v952_v25 = vmul.f32 %v734_v46, %v1489_v50  ;;  %v956_v26 = vmul.f32 %v734_v46, %v1491_v51 }
 0x168   :  { %1215 = vmatprep.subr.bf16.mxu0 %v1214_v21  ;;  %v943_v29 = vmul.f32 %v714_v8, %v1471_v0  ;;  %v947_v27 = vmul.f32 %v714_v8, %v1473_v2  ;;  %v945_v28 = vmul.f32 %v722_v23, %v1481_v39  ;;  %v949_v30 = vmul.f32 %v722_v23, %v1483_v40 }
 0x169   :  { %1279 = vmatprep.subr.bf16.mxu1 %v1278_v24  ;;  %v1218_v31 = vpack.c.bf16 %v956_v26, %v952_v25  ;;  %v954_v32 = vmul.f32 %v742_v47, %v1495_v55  ;;  %v958_v33 = vmul.f32 %v742_v47, %v1497_v56  ;;  %v730_v34 = vrot.slane %v1513_v12, %v1440_v15 }
 0x16a   :  { %v1216_v36 = vpack.c.bf16 %v947_v27, %v943_v29  ;;  %v1280_v37 = vpack.c.bf16 %v949_v30, %v945_v28  ;;  %v738_v9 = vrot.slane %v1513_v12, %v1464_v54  ;;  %v750_v38 = vrot.slane %v1519_v16, %v1437_v14 }
 0x16b   :  { %v1282_v22 = vpack.c.bf16 %v958_v33, %v954_v32  ;;  %v951_v41 = vmul.f32 %v730_v34, %v1471_v0  ;;  %v955_v42 = vmul.f32 %v730_v34, %v1473_v2  ;;  %v758_v43 = vrot.slane %v1519_v16, %v1468_v58 }
 0x16c   :  { %1217 = vmatpush1.bf16.msra.mxu0 %v1216_v36  ;;  %1281 = vmatpush1.bf16.msra.mxu1 %v1280_v37  ;;  %v953_v44 = vmul.f32 %v738_v9, %v1481_v39  ;;  %v957_v45 = vmul.f32 %v738_v9, %v1483_v40  ;;  %v960_v46 = vmul.f32 %v750_v38, %v1489_v50 }
 0x16d   :  { %1219 = vmatprep.subr.bf16.mxu0 %v1218_v31  ;;  %1283 = vmatprep.subr.bf16.mxu1 %v1282_v22  ;;  %v1220_v47 = vpack.c.bf16 %v955_v42, %v951_v41  ;;  %v964_v48 = vmul.f32 %v750_v38, %v1491_v51  ;;  %v962_v10 = vmul.f32 %v758_v43, %v1495_v55 }
 0x16e   :  { %v1284_v49 = vpack.c.bf16 %v957_v45, %v953_v44  ;;  %v966_v11 = vmul.f32 %v758_v43, %v1497_v56  ;;  %v746_v52 = vrot.slane %v1519_v16, %v1440_v15  ;;  %v754_v53 = vrot.slane %v1519_v16, %v1464_v54 }
 0x16f   :  { %v1222_v13 = vpack.c.bf16 %v964_v48, %v960_v46  ;;  %v532_v59 = vcombine.high %v1513_v12, %v1513_v12  ;;  %v534_v57 = vcombine.high %v1519_v16, %v1519_v16 }
 0x170   :  { %1221 = vmatpush1.bf16.msra.mxu0 %v1220_v47  ;;  %1285 = vmatpush1.bf16.msra.mxu1 %v1284_v49  ;;  %v1286_v63 = vpack.c.bf16 %v966_v11, %v962_v10  ;;  %v959_v60 = vmul.f32 %v746_v52, %v1471_v0  ;;  %v963_v1 = vmul.f32 %v746_v52, %v1473_v2 }
 0x171   :  { %1223 = vmatprep.subr.bf16.mxu0 %v1222_v13  ;;  %v961_v4 = vmul.f32 %v754_v53, %v1481_v39  ;;  %v965_v61 = vmul.f32 %v754_v53, %v1483_v40  ;;  %v766_v5 = vrot.slane %v532_v59, %v1437_v14  ;;  %v774_v62 = vrot.slane %v532_v59, %v1468_v58 }
 0x172   :  { %1287 = vmatprep.subr.bf16.mxu1 %v1286_v63  ;;  %v1224_v12 = vpack.c.bf16 %v963_v1, %v959_v60  ;;  %v762_v16 = vrot.slane %v532_v59, %v1440_v15  ;;  %v770_v6 = vrot.slane %v532_v59, %v1464_v54  ;;  %v782_v7 = vrot.slane %v534_v57, %v1437_v14 }
 0x173   :  { %v1288_v3 = vpack.c.bf16 %v965_v61, %v961_v4  ;;  %v968_v17 = vmul.f32 %v766_v5, %v1489_v50  ;;  %v972_v18 = vmul.f32 %v766_v5, %v1491_v51  ;;  %v970_v19 = vmul.f32 %v774_v62, %v1495_v55 }
 0x174   :  { %1225 = vmatpush1.bf16.msra.mxu0 %v1224_v12  ;;  %v974_v20 = vmul.f32 %v774_v62, %v1497_v56  ;;  %v967_v21 = vmul.f32 %v762_v16, %v1471_v0  ;;  %v971_v8 = vmul.f32 %v762_v16, %v1473_v2  ;;  %v969_v23 = vmul.f32 %v770_v6, %v1481_v39 }
 0x175   :  { %1289 = vmatpush1.bf16.msra.mxu1 %v1288_v3  ;;  %v1226_v24 = vpack.c.bf16 %v972_v18, %v968_v17  ;;  %v973_v14 = vmul.f32 %v770_v6, %v1483_v40  ;;  %v976_v25 = vmul.f32 %v782_v7, %v1489_v50  ;;  %v980_v26 = vmul.f32 %v782_v7, %v1491_v51 }
 0x176   :  { %v1290_v29 = vpack.c.bf16 %v974_v20, %v970_v19  ;;  %v1228_v27 = vpack.c.bf16 %v971_v8, %v967_v21  ;;  %v790_v28 = vrot.slane %v534_v57, %v1468_v58  ;;  %v778_v30 = vrot.slane %v534_v57, %v1440_v15 }
 0x177   :  { %1227 = vmatprep.subr.bf16.mxu0 %v1226_v24  ;;  %v1292_v31 = vpack.c.bf16 %v973_v14, %v969_v23  ;;  %v1230_v32 = vpack.c.bf16 %v980_v26, %v976_v25  ;;  %v786_v33 = vrot.slane %v534_v57, %v1464_v54 }
 0x178   :  { %1291 = vmatprep.subr.bf16.mxu1 %v1290_v29  ;;  %1229 = vmatpush1.bf16.msra.mxu0 %v1228_v27  ;;  %v978_v34 = vmul.f32 %v790_v28, %v1495_v55  ;;  %v982_v36 = vmul.f32 %v790_v28, %v1497_v56  ;;  %v975_v50 = vmul.f32 %v778_v30, %v1471_v0 }
 0x179   :  { %1293 = vmatpush1.bf16.msra.mxu1 %v1292_v31  ;;  %1231 = vmatprep.subr.bf16.mxu0 %v1230_v32  ;;  %v979_v51 = vmul.f32 %v778_v30, %v1473_v2  ;;  %v977_v58 = vmul.f32 %v786_v33, %v1481_v39  ;;  %v981_v15 = vmul.f32 %v786_v33, %v1483_v40 }
 0x17a   :  { %v1294_v37 = vpack.c.bf16 %v982_v36, %v978_v34 }
 0x17b   :  { %v1232_v9 = vpack.c.bf16 %v979_v51, %v975_v50  ;;  %v1296_v38 = vpack.c.bf16 %v981_v15, %v977_v58 }
 0x17c   :  { %1295 = vmatprep.subr.bf16.mxu1 %v1294_v37 }
 0x17d   :  { %1233 = vmatpush1.bf16.msra.mxu0 %v1232_v9  ;;  %1297 = vmatpush1.bf16.msra.mxu1 %v1296_v38 }
 0x180   :  { %1052 = vmatmul.mubr.f32.vlgmr.msra.gmra.mrb[2].mxu0 %v1431_v35  ;;  %1123 = vmatmul.mubr.f32.vlgmr.msra.gmra.mrb[2].mxu1 %v1431_v35 }
 0x253   :  { %v1053_v54 = vpop.f32.mrb[2].mxu0  ;;  %v1124_v0 = vpop.f32.mrb[2].mxu1 }
 0x254   :  { %v1055_v55 = vpop.f32.mrb[3].mxu0  ;;  %v1126_v2 = vpop.f32.mrb[3].mxu1 }
 0x255   :  { %v1133_v56 = vcombine.low %v1053_v54, %v1055_v55  ;;  %v1134_v39 = vcombine.low %v1124_v0, %v1126_v2 }
 0x257   :  { %1137 = vst [vmem:[#allocation7] sm:$0xff] %v1133_v56  ;;  %1138 = vst [vmem:[#allocation7 + $0x8] sm:$0xff] %v1134_v39 }
 0x258   :  { %1360 = shalt.err (!%p1357_p6)
}
 0x259   :  { %s1361_s8 = scalar_lea.hbm %s1765_s2, 256 }
 0x25a   :  { %p1362_p7 = scmp.ne.s32.totalorder %s1765_s2, %s1361_s8  ;;  %p1365_p8 = scmp.lt.u32.totalorder %s1361_s8, %s1765_s2 }
 0x25c   :  { %p1367_p9 = pnand %p1365_p8, %p1362_p7 }
 0x25e   :  { %1370 = shalt.err (!%p1367_p9)
}
 0x25f   :  { %1148 = dma.vmem_to_hbm [thread:$0]  %s1146_s4, 256, %s1765_s2, [#allocation4]  }
 0x260   :  { %1375 = dma.done.wait [#allocation4], 256  }
 0x261   :  { %1376 = vsyncadd [#allocation4], 4294967040 }
 0x262   :  { %1152 = vsyncpa [#allocation3], 1 }
 0x263   :  { %1153 = vsyncpa [#allocation6], 1 }
 0x264   :  { %1154 = vsyncpa [#allocation4], 1 }

</bundles_post_ra>
